<compile_context>
chip_gen: v5e
topology: v5e:2x2
jax: 0.10.0
libtpu: 0.0.40
codegen_flags: <defaults>
</compile_context>

<pallas_src>
import functools

import jax
import jax.numpy as jnp
from jax.experimental import pallas as pl
from jax.experimental.pallas import tpu as pltpu

_LANE = 128
_SUB = 8
_MAX_BATCH_TILE = 512  # big tiles for v5e/v6e; small enough that v7x still splits


def _round_up(x, m):
    return ((x + m - 1) // m) * m


def _fused_mlp_kernel(x_ref, w1_ref, w2_ref, w3_ref, w4_ref, b_all_ref, o_ref,
                      *, h1, h2, h3, n_out_pad):
    """Whole 4-layer MLP on one batch tile; weights are VMEM-resident.

    x/w refs are bf16, biases are one concatenated f32 row; all matmuls
    accumulate in f32 on the MXU, epilogues (bias + ReLU) stay f32.
    """
    # Lane-aligned offsets into the concatenated bias row (padded at prep time).
    o1 = 0
    o2 = o1 + _round_up(h1, _LANE)
    o3 = o2 + _round_up(h2, _LANE)
    o4 = o3 + _round_up(h3, _LANE)

    b1 = b_all_ref[:, o1:o1 + h1]
    b2 = b_all_ref[:, o2:o2 + h2]
    b3 = b_all_ref[:, o3:o3 + h3]
    b4 = b_all_ref[:, o4:o4 + n_out_pad]

    h = jnp.dot(x_ref[...], w1_ref[...], preferred_element_type=jnp.float32)
    h = jnp.maximum(h + b1, 0.0)

    h = jnp.dot(h.astype(jnp.bfloat16), w2_ref[...],
                preferred_element_type=jnp.float32)
    h = jnp.maximum(h + b2, 0.0)

    h = jnp.dot(h.astype(jnp.bfloat16), w3_ref[...],
                preferred_element_type=jnp.float32)
    h = jnp.maximum(h + b3, 0.0)

    y = jnp.dot(h.astype(jnp.bfloat16), w4_ref[...],
                preferred_element_type=jnp.float32) + b4
    o_ref[...] = y.astype(o_ref.dtype)


@functools.lru_cache(maxsize=None)
def _build_fused_call(batch_pad, bt, n_in, h1, h2, h3, n_out_pad, b_total,
                      out_dtype_name):
    """Construct the fused pallas_call once per shape signature."""
    out_dtype = jnp.dtype(out_dtype_name)
    grid = (batch_pad // bt,)

    def const(shape):
        # Full-array block, same block index every grid step -> fetched once,
        # stays resident in VMEM across the whole grid.
        return pl.BlockSpec(shape, lambda i: (0, 0))

    kernel = functools.partial(_fused_mlp_kernel,
                               h1=h1, h2=h2, h3=h3, n_out_pad=n_out_pad)

    in_specs = [
        pl.BlockSpec((bt, n_in), lambda i: (i, 0)),   # activation tile
        const((n_in, h1)),
        const((h1, h2)),
        const((h2, h3)),
        const((h3, n_out_pad)),
        const((1, b_total)),                          # all biases, one row
    ]
    out_specs = pl.BlockSpec((bt, n_out_pad), lambda i: (i, 0))

    # Explicit VMEM budget with ~2x headroom (matters on v7x's 64 MiB VMEM).
    weight_bytes = 2 * (n_in * h1 + h1 * h2 + h2 * h3 + h3 * n_out_pad) + 4 * b_total
    act_bytes = 2 * bt * n_in * 2 + 2 * bt * n_out_pad * out_dtype.itemsize
    tmp_bytes = 4 * bt * (h1 + h2 + h3 + n_out_pad)
    vmem_limit = min(2 * (weight_bytes + act_bytes + tmp_bytes) + (4 << 20),
                     48 << 20)

    return pl.pallas_call(
        kernel,
        out_shape=jax.ShapeDtypeStruct((batch_pad, n_out_pad), out_dtype),
        grid=grid,
        in_specs=in_specs,
        out_specs=out_specs,
        compiler_params=pltpu.CompilerParams(
            dimension_semantics=("parallel",),
            vmem_limit_bytes=int(vmem_limit),
        ),
    )


def prepare_nnet_params(params):
    """One-time transform of raw f32 params into the kernel-ready form:
    bf16 weights, lane-padded final layer, and all biases concatenated into
    one lane-aligned f32 row.  Returns (prepared_dict, n_out)."""
    assert len(params) == 4, "this fused kernel expects hlayers of length 3"
    (w1, b1), (w2, b2), (w3, b3), (w4, b4) = params
    h1, h2, h3 = w1.shape[1], w2.shape[1], w3.shape[1]
    n_out = w4.shape[1]
    n_out_pad = _round_up(max(n_out, _LANE), _LANE)

    # Lane-dense final layer: pad n_out columns up to a multiple of 128 once.
    w4p = jnp.zeros((h3, n_out_pad), w4.dtype).at[:, :n_out].set(w4)
    b4p = jnp.zeros((n_out_pad,), jnp.float32).at[:n_out].set(
        jnp.reshape(b4, (-1,)).astype(jnp.float32))

    def seg(b, width):
        pad = _round_up(width, _LANE)
        return jnp.zeros((pad,), jnp.float32).at[:width].set(
            jnp.reshape(b, (-1,)).astype(jnp.float32))

    b_all = jnp.concatenate(
        [seg(b1, h1), seg(b2, h2), seg(b3, h3), seg(b4p, n_out_pad)])[None, :]

    prepared = dict(
        w1=w1.astype(jnp.bfloat16),
        w2=w2.astype(jnp.bfloat16),
        w3=w3.astype(jnp.bfloat16),
        w4=w4p.astype(jnp.bfloat16),
        b_all=b_all,
    )
    return prepared, n_out


@functools.partial(jax.jit, static_argnames=("n_out",))
def nnet_forward(prepared, x, *, n_out):
    """Fused, jitted forward pass matching the PyTorch module
    (ReLU on all hidden layers, none on the output layer)."""
    w1, w2, w3, w4 = prepared["w1"], prepared["w2"], prepared["w3"], prepared["w4"]
    b_all = prepared["b_all"]

    batch, n_in = x.shape
    h1, h2, h3 = w1.shape[1], w2.shape[1], w3.shape[1]
    n_out_pad = w4.shape[1]

    # Batch tile selection:
    #  - tiny batch: one grid step (launch-count floor)
    #  - otherwise: >=2 "parallel" steps so v7x's two TensorCores both work,
    #    capped at _MAX_BATCH_TILE rows for v5e/v6e big-batch efficiency.
    if batch <= 16:
        bt = _round_up(batch, _SUB)
    else:
        bt = min(_MAX_BATCH_TILE, _round_up(pl.cdiv(batch, 2), _SUB))
    batch_pad = _round_up(batch, bt)

    x_in = x.astype(jnp.bfloat16)
    if batch_pad != batch:
        x_in = jnp.zeros((batch_pad, n_in), jnp.bfloat16).at[:batch, :].set(x_in)

    call = _build_fused_call(batch_pad, bt, n_in, h1, h2, h3, n_out_pad,
                             b_all.shape[1], jnp.dtype(x.dtype).name)
    out = call(x_in, w1, w2, w3, w4, b_all)
    return out[:batch, :n_out]


def init_nnet_params(key, n_in, n_out, hlayers=(128, 256, 128)):
    """Deterministic parameter init mirroring the PyTorch module:
    xavier_uniform weights, default PyTorch Linear bias init."""
    dims = [n_in] + list(hlayers) + [n_out]
    params = []
    for li in range(len(dims) - 1):
        fan_in, fan_out = dims[li], dims[li + 1]
        key, kw, kb = jax.random.split(key, 3)
        # xavier_uniform_: U(-a, a), a = sqrt(6 / (fan_in + fan_out))
        a = (6.0 / (fan_in + fan_out)) ** 0.5
        w = jax.random.uniform(kw, (fan_in, fan_out), jnp.float32, -a, a)
        # PyTorch Linear default bias init: U(-1/sqrt(fan_in), 1/sqrt(fan_in))
        bbound = 1.0 / (fan_in ** 0.5)
        b = jax.random.uniform(kb, (1, fan_out), jnp.float32, -bbound, bbound)
        params.append((w, b))
    return params


def nnet_forward_ref(params, x):
    """Pure-JAX reference mirroring the kernel's numerics:
    bf16 MXU inputs, f32 accumulation, f32 bias-add / ReLU."""
    n_layers = len(params)
    h = x
    for i, (w, b) in enumerate(params):
        h = jnp.dot(h.astype(jnp.bfloat16), w.astype(jnp.bfloat16),
                    preferred_element_type=jnp.float32)
        h = h + jnp.reshape(b, (1, -1)).astype(jnp.float32)
        if i < n_layers - 1:
            h = jnp.maximum(h, 0.0)
    return h.astype(x.dtype)


if __name__ == "__main__":
    key = jax.random.PRNGKey(0)
    n_in, n_out = 32, 16
    batch = 8

    kparam, kx = jax.random.split(key)
    params = init_nnet_params(kparam, n_in, n_out, hlayers=(128, 256, 128))
    x = jax.random.normal(kx, (batch, n_in), jnp.float32)

    prepared, n_out_static = prepare_nnet_params(params)
    out = nnet_forward(prepared, x, n_out=n_out_static)
    out = jax.block_until_ready(out)

    ref = nnet_forward_ref(params, x)
    assert out.shape == (batch, n_out), out.shape
    assert jnp.allclose(out, ref, atol=1e-2, rtol=1e-2), "mismatch vs reference"

    print("KERNEL_OK")
</pallas_src>

<mosaic_0001>
module attributes {stable_mosaic.version = 11 : i64} {
  func.func @_fused_mlp_kernel(%arg0: i32, %arg1: memref<8x32xbf16, #tpu.memory_space<vmem>>, %arg2: memref<32x128xbf16, #tpu.memory_space<vmem>>, %arg3: memref<128x256xbf16, #tpu.memory_space<vmem>>, %arg4: memref<256x128xbf16, #tpu.memory_space<vmem>>, %arg5: memref<128x128xbf16, #tpu.memory_space<vmem>>, %arg6: memref<1x640xf32, #tpu.memory_space<vmem>>, %arg7: memref<8x128xf32, #tpu.memory_space<vmem>>) attributes {dimension_semantics = [#tpu.dimension_semantics<parallel>], iteration_bounds = array<i64: 1>, scalar_prefetch = 0 : i64, scratch_operands = 0 : i64, tpu.core_type = #tpu.core_type<tc>, window_params = [{transform_indices = @transform_0, window_bounds = array<i64: 8, 32>}, {pipeline_mode = #tpu.pipeline_mode<synchronous>, transform_indices = @transform_1, window_bounds = array<i64: 32, 128>}, {pipeline_mode = #tpu.pipeline_mode<synchronous>, transform_indices = @transform_2, window_bounds = array<i64: 128, 256>}, {pipeline_mode = #tpu.pipeline_mode<synchronous>, transform_indices = @transform_3, window_bounds = array<i64: 256, 128>}, {pipeline_mode = #tpu.pipeline_mode<synchronous>, transform_indices = @transform_4, window_bounds = array<i64: 128, 128>}, {pipeline_mode = #tpu.pipeline_mode<synchronous>, transform_indices = @transform_5, window_bounds = array<i64: 1, 640>}, {transform_indices = @transform_6, window_bounds = array<i64: 8, 128>}]} {
    %c0 = arith.constant 0 : index
    %c0_0 = arith.constant 0 : index
    %0 = vector.load %arg6[%c0, %c0_0] : memref<1x640xf32, #tpu.memory_space<vmem>>, vector<1x128xf32>
    %c0_1 = arith.constant 0 : index
    %c128 = arith.constant 128 : index
    %1 = vector.load %arg6[%c0_1, %c128] : memref<1x640xf32, #tpu.memory_space<vmem>>, vector<1x256xf32>
    %c0_2 = arith.constant 0 : index
    %c384 = arith.constant 384 : index
    %2 = vector.load %arg6[%c0_2, %c384] : memref<1x640xf32, #tpu.memory_space<vmem>>, vector<1x128xf32>
    %c0_3 = arith.constant 0 : index
    %c512 = arith.constant 512 : index
    %3 = vector.load %arg6[%c0_3, %c512] : memref<1x640xf32, #tpu.memory_space<vmem>>, vector<1x128xf32>
    %c0_4 = arith.constant 0 : index
    %c0_5 = arith.constant 0 : index
    %4 = vector.load %arg1[%c0_4, %c0_5] : memref<8x32xbf16, #tpu.memory_space<vmem>>, vector<8x32xbf16>
    %c0_6 = arith.constant 0 : index
    %c0_7 = arith.constant 0 : index
    %5 = vector.load %arg2[%c0_6, %c0_7] : memref<32x128xbf16, #tpu.memory_space<vmem>>, vector<32x128xbf16>
    %cst = arith.constant dense<0.000000e+00> : vector<8x128xf32>
    %6 = tpu.matmul %4, %5, %cst {dimension_numbers = #tpu.dot_dimension_numbers<[1], [0], [0], [1], [0, 0, 1, 1], [], []>} : vector<8x32xbf16>, vector<32x128xbf16>, vector<8x128xf32> -> vector<8x128xf32>
    %7 = vector.broadcast %0 : vector<1x128xf32> to vector<8x128xf32>
    %8 = arith.addf %6, %7 : vector<8x128xf32>
    %cst_8 = arith.constant 0.000000e+00 : f32
    %9 = vector.broadcast %cst_8 : f32 to vector<8x128xf32>
    %10 = arith.maximumf %8, %9 : vector<8x128xf32>
    %11 = arith.truncf %10 : vector<8x128xf32> to vector<8x128xbf16>
    %c0_9 = arith.constant 0 : index
    %c0_10 = arith.constant 0 : index
    %12 = vector.load %arg3[%c0_9, %c0_10] : memref<128x256xbf16, #tpu.memory_space<vmem>>, vector<128x256xbf16>
    %cst_11 = arith.constant dense<0.000000e+00> : vector<8x256xf32>
    %13 = tpu.matmul %11, %12, %cst_11 {dimension_numbers = #tpu.dot_dimension_numbers<[1], [0], [0], [1], [0, 0, 1, 1], [], []>} : vector<8x128xbf16>, vector<128x256xbf16>, vector<8x256xf32> -> vector<8x256xf32>
    %14 = vector.broadcast %1 : vector<1x256xf32> to vector<8x256xf32>
    %15 = arith.addf %13, %14 : vector<8x256xf32>
    %cst_12 = arith.constant 0.000000e+00 : f32
    %16 = vector.broadcast %cst_12 : f32 to vector<8x256xf32>
    %17 = arith.maximumf %15, %16 : vector<8x256xf32>
    %18 = arith.truncf %17 : vector<8x256xf32> to vector<8x256xbf16>
    %c0_13 = arith.constant 0 : index
    %c0_14 = arith.constant 0 : index
    %19 = vector.load %arg4[%c0_13, %c0_14] : memref<256x128xbf16, #tpu.memory_space<vmem>>, vector<256x128xbf16>
    %cst_15 = arith.constant dense<0.000000e+00> : vector<8x128xf32>
    %20 = tpu.matmul %18, %19, %cst_15 {dimension_numbers = #tpu.dot_dimension_numbers<[1], [0], [0], [1], [0, 0, 1, 1], [], []>} : vector<8x256xbf16>, vector<256x128xbf16>, vector<8x128xf32> -> vector<8x128xf32>
    %21 = vector.broadcast %2 : vector<1x128xf32> to vector<8x128xf32>
    %22 = arith.addf %20, %21 : vector<8x128xf32>
    %cst_16 = arith.constant 0.000000e+00 : f32
    %23 = vector.broadcast %cst_16 : f32 to vector<8x128xf32>
    %24 = arith.maximumf %22, %23 : vector<8x128xf32>
    %25 = arith.truncf %24 : vector<8x128xf32> to vector<8x128xbf16>
    %c0_17 = arith.constant 0 : index
    %c0_18 = arith.constant 0 : index
    %26 = vector.load %arg5[%c0_17, %c0_18] : memref<128x128xbf16, #tpu.memory_space<vmem>>, vector<128x128xbf16>
    %cst_19 = arith.constant dense<0.000000e+00> : vector<8x128xf32>
    %27 = tpu.matmul %25, %26, %cst_19 {dimension_numbers = #tpu.dot_dimension_numbers<[1], [0], [0], [1], [0, 0, 1, 1], [], []>} : vector<8x128xbf16>, vector<128x128xbf16>, vector<8x128xf32> -> vector<8x128xf32>
    %28 = vector.broadcast %3 : vector<1x128xf32> to vector<8x128xf32>
    %29 = arith.addf %27, %28 : vector<8x128xf32>
    %c0_20 = arith.constant 0 : index
    %c0_21 = arith.constant 0 : index
    %30 = vector.load %arg7[%c0_20, %c0_21] : memref<8x128xf32, #tpu.memory_space<vmem>>, vector<8x128xf32>
    tpu.vector_store %arg7[%c0_20, %c0_21], %29 {strides = array<i32>} : memref<8x128xf32, #tpu.memory_space<vmem>>, vector<8x128xf32>,
    return
  }
  func.func @transform_0(%arg0: i32) -> (i32, i32) {
    %c0_i32 = arith.constant 0 : i32
    %c0_i32_0 = arith.constant 0 : i32
    return %arg0, %c0_i32 : i32, i32
  }
  func.func @transform_1(%arg0: i32) -> (i32, i32) {
    %c0_i32 = arith.constant 0 : i32
    %c0_i32_0 = arith.constant 0 : i32
    %c0_i32_1 = arith.constant 0 : i32
    return %c0_i32, %c0_i32_0 : i32, i32
  }
  func.func @transform_2(%arg0: i32) -> (i32, i32) {
    %c0_i32 = arith.constant 0 : i32
    %c0_i32_0 = arith.constant 0 : i32
    %c0_i32_1 = arith.constant 0 : i32
    return %c0_i32, %c0_i32_0 : i32, i32
  }
  func.func @transform_3(%arg0: i32) -> (i32, i32) {
    %c0_i32 = arith.constant 0 : i32
    %c0_i32_0 = arith.constant 0 : i32
    %c0_i32_1 = arith.constant 0 : i32
    return %c0_i32, %c0_i32_0 : i32, i32
  }
  func.func @transform_4(%arg0: i32) -> (i32, i32) {
    %c0_i32 = arith.constant 0 : i32
    %c0_i32_0 = arith.constant 0 : i32
    %c0_i32_1 = arith.constant 0 : i32
    return %c0_i32, %c0_i32_0 : i32, i32
  }
  func.func @transform_5(%arg0: i32) -> (i32, i32) {
    %c0_i32 = arith.constant 0 : i32
    %c0_i32_0 = arith.constant 0 : i32
    %c0_i32_1 = arith.constant 0 : i32
    return %c0_i32, %c0_i32_0 : i32, i32
  }
  func.func @transform_6(%arg0: i32) -> (i32, i32) {
    %c0_i32 = arith.constant 0 : i32
    %c0_i32_0 = arith.constant 0 : i32
    return %arg0, %c0_i32 : i32, i32
  }
}

</mosaic_0001>

<bundles_post_ra>
// kernel: nnet_forward.1
= control target key start
LH: loop header
LB: loop body
LE: loop exit
PB: predicated region body
PF: predicated region fallthrough
CT: control target
= control target key end

     0   :  { %11 = vsyncpa [#allocation3], 0  ;;  %s946_s0 = inlined_call_operand.vmem [shape: bf16[8,32], index: 0, kind: input, shape index: {}]   ;;  %s947_s1 = inlined_call_operand.hbm [shape: bf16[32,128], index: 1, kind: input, shape index: {}]   ;;  %s948_s2 = inlined_call_operand.hbm [shape: bf16[128,256], index: 2, kind: input, shape index: {}]   ;;  %s949_s3 = inlined_call_operand.hbm [shape: bf16[256,128], index: 3, kind: input, shape index: {}]   ;;  %s950_s4 = inlined_call_operand.hbm [shape: bf16[128,128], index: 4, kind: input, shape index: {}]   ;;  %s951_s5 = inlined_call_operand.vmem [shape: f32[1,640], index: 5, kind: input, shape index: {}]   ;;  %s952_s6 = inlined_call_operand.hbm [shape: f32[8,128], index: 6, kind: output, shape index: {}]  }
   0x1   :  { %12 = vsyncpa [#allocation6], 0 }
   0x2   :  { %13 = vsyncpa [#allocation9], 0  ;;  %s34_s23 = sshll.u32 %s948_s2, 4  ;;  %s35_s23 = int_to_ptr.hbm [resolvable:$true] %s34_s23 }
   0x3   :  { %14 = vsyncpa [#allocation4], 0  ;;  %s872_s24 = smov [#allocation5]   ;;  %s21_s28 = sshll.u32 %s947_s1, 4  ;;  %s22_s28 = int_to_ptr.hbm [resolvable:$true] %s21_s28 }
   0x4   :  { %s36_s25 = sshll.u32 %s872_s24, 4  ;;  %s873_s29 = smov 128   ;;  %s37_s25 = int_to_ptr.vmem [resolvable:$true] %s36_s25 }
   0x5   :  { %s874_s30 = smov 8   ;;  %s875_s7 = smov [#allocation2]  }
   0x6   :  { %42 = dma.hbm_to_vmem [thread:$0]  %s35_s23, 2048, %s37_s25, [#allocation6], %s873_s29, %s873_s29, %s874_s30  }
   0x7   :  { %s23_s8 = sshll.u32 %s875_s7, 4  ;;  %s876_s9 = smov 64   ;;  %s24_s8 = int_to_ptr.vmem [resolvable:$true] %s23_s8 }
   0x8   :  { %s877_s10 = smov 4   ;;  %s47_s12 = sshll.u32 %s949_s3, 4  ;;  %s48_s12 = int_to_ptr.hbm [resolvable:$true] %s47_s12 }
   0x9   :  { %29 = dma.hbm_to_vmem [thread:$0]  %s22_s28, 256, %s24_s8, [#allocation3], %s876_s9, %s876_s9, %s877_s10  }
   0xa   :  { %s878_s13 = smov [#allocation7]   ;;  %s60_s16 = sshll.u32 %s950_s4, 4  ;;  %s61_s16 = int_to_ptr.hbm [resolvable:$true] %s60_s16 }
   0xb   :  { %s49_s14 = sshll.u32 %s878_s13, 4  ;;  %s879_s17 = smov [#allocation8]   ;;  %s50_s14 = int_to_ptr.vmem [resolvable:$true] %s49_s14 }
   0xc   :  { %55 = dma.hbm_to_vmem [thread:$0]  %s48_s12, 2048, %s50_s14, [#allocation6], %s876_s9, %s876_s9, %s877_s10  }
   0xd   :  { %s62_s18 = sshll.u32 %s879_s17, 4  ;;  %s63_s18 = int_to_ptr.vmem [resolvable:$true] %s62_s18 }
   0xe   :  { %68 = dma.hbm_to_vmem [thread:$0]  %s61_s16, 1024, %s63_s18, [#allocation9], %s876_s9, %s876_s9, %s877_s10  }
   0xf   :  { %864 = dma.done.wait [#allocation3], 256  }
  0x10   :  { %865 = vsyncadd [#allocation3], 4294967040 }
  0x11   :  { %866 = dma.done.wait [#allocation6], 4096  }
  0x12   :  { %867 = vsyncadd [#allocation6], 4294963200 }
  0x13   :  { %868 = dma.done.wait [#allocation9], 1024  }
  0x14   :  { %869 = vsyncadd [#allocation9], 4294966272  ;;  %v691_v0 = vld [vmem:[#allocation2 + $0x8] sm:$0xff]  ;;  %v690_v1 = vld [vmem:[#allocation2] sm:$0xff]  ;;  %vm112_vm0 = vcmask 261120   ;;  %s880_s26 = smov [#allocation10]  }
  0x15   :  { %v588_v2 = vld [vmem:[#allocation5 + $0x70] sm:$0xf]  ;;  %v707_v3 = vld [vmem:[#allocation5 + $0x74] sm:$0xf0]  ;;  %v706_v4 = vld [vmem:[#allocation5 + $0x74] sm:$0xf]  ;;  %122 = vmatpush.bf16.msra.mxu0 %v691_v0 }
  0x16   :  { %v589_v5 = vor.u32 %v707_v3, %v588_v2  ;;  %v590_v6 = vld [vmem:[#allocation5 + $0x78] sm:$0xf0]  ;;  %v580_v7 = vld [vmem:[#allocation5 + $0x60] sm:$0xf]  ;;  %v705_v8 = vld [vmem:[#allocation5 + $0x64] sm:$0xf0] }
  0x17   :  { %v593_v9 = vor.u32 %v706_v4, %v590_v6  ;;  %v704_v10 = vld [vmem:[#allocation5 + $0x64] sm:$0xf]  ;;  %v582_v11 = vld [vmem:[#allocation5 + $0x68] sm:$0xf0]  ;;  %v581_v12 = vor.u32 %v705_v8, %v580_v7  ;;  %v572_v14 = vld [vmem:[#allocation5 + $0x50] sm:$0xf] }
  0x18   :  { %232 = vmatpush.bf16.msra.mxu1 %v589_v5  ;;  %v585_v13 = vor.u32 %v704_v10, %v582_v11  ;;  %v703_v15 = vld [vmem:[#allocation5 + $0x54] sm:$0xf0]  ;;  %v92_v16 = vld [vmem:[%s946_s0] sm:$0xf]  ;;  %v702_v17 = vld [vmem:[#allocation5 + $0x54] sm:$0xf] }
  0x19   :  { %245 = vmatpush.bf16.msra.mxu2 %v593_v9  ;;  %123 = vmatpush.bf16.msra.mxu0 %v690_v1  ;;  %v574_v18 = vld [vmem:[#allocation5 + $0x58] sm:$0xf0]  ;;  %v573_v19 = vor.u32 %v703_v15, %v572_v14  ;;  %v564_v20 = vld [vmem:[#allocation5 + $0x40] sm:$0xf]  ;;  %v701_v22 = vld [vmem:[#allocation5 + $0x44] sm:$0xf0] }
  0x1a   :  { %v577_v21 = vor.u32 %v702_v17, %v574_v18  ;;  %v700_v23 = vld [vmem:[#allocation5 + $0x44] sm:$0xf]  ;;  %v566_v24 = vld [vmem:[#allocation5 + $0x48] sm:$0xf0]  ;;  %v565_v25 = vor.u32 %v701_v22, %v564_v20  ;;  %v556_v27 = vld [vmem:[#allocation5 + $0x30] sm:$0xf] }
  0x1b   :  { %v569_v26 = vor.u32 %v700_v23, %v566_v24  ;;  %v699_v28 = vld [vmem:[#allocation5 + $0x34] sm:$0xf0]  ;;  %v698_v29 = vld [vmem:[#allocation5 + $0x34] sm:$0xf]  ;;  %v558_v30 = vld [vmem:[#allocation5 + $0x38] sm:$0xf0] }
  0x1c   :  { %233 = vmatpush.bf16.msra.mxu1 %v581_v12  ;;  %529 = vmatmul.msk.bf16.vlgmr.msra.gmra.mxu0 %vm112_vm0, %v92_v16  ;;  %v557_v31 = vor.u32 %v699_v28, %v556_v27  ;;  %v561_v32 = vor.u32 %v698_v29, %v558_v30  ;;  %v548_v33 = vld [vmem:[#allocation5 + $0x20] sm:$0xf]  ;;  %v697_v34 = vld [vmem:[#allocation5 + $0x24] sm:$0xf0]  ;;  %v696_v35 = vld [vmem:[#allocation5 + $0x24] sm:$0xf] }
  0x1d   :  { %246 = vmatpush.bf16.msra.mxu2 %v585_v13  ;;  %v550_v36 = vld [vmem:[#allocation5 + $0x28] sm:$0xf0]  ;;  %v549_v37 = vor.u32 %v697_v34, %v548_v33  ;;  %v540_v39 = vld [vmem:[#allocation5 + $0x10] sm:$0xf]  ;;  %v695_v40 = vld [vmem:[#allocation5 + $0x14] sm:$0xf0] }
  0x1e   :  { %v553_v38 = vor.u32 %v696_v35, %v550_v36  ;;  %v694_v41 = vld [vmem:[#allocation5 + $0x14] sm:$0xf]  ;;  %v541_v42 = vor.u32 %v695_v40, %v540_v39  ;;  %v542_v43 = vld [vmem:[#allocation5 + $0x18] sm:$0xf0]  ;;  %v532_v45 = vld [vmem:[#allocation5] sm:$0xf] }
  0x1f   :  { %v545_v44 = vor.u32 %v694_v41, %v542_v43  ;;  %v693_v46 = vld [vmem:[#allocation5 + $0x4] sm:$0xf0]  ;;  %v692_v47 = vld [vmem:[#allocation5 + $0x4] sm:$0xf]  ;;  %v534_v49 = vld [vmem:[#allocation5 + $0x8] sm:$0xf0] }
  0x20   :  { %234 = vmatpush.bf16.msra.mxu1 %v573_v19  ;;  %v533_v48 = vor.u32 %v693_v46, %v532_v45  ;;  %v537_v50 = vor.u32 %v692_v47, %v534_v49  ;;  %v715_v51 = vld [vmem:[#allocation7 + $0x38] sm:$0xff]  ;;  %v714_v53 = vld [vmem:[#allocation7 + $0x30] sm:$0xff]  ;;  %v713_v55 = vld [vmem:[#allocation7 + $0x28] sm:$0xff]  ;;  %s507_s27 = sshll.u32 %s880_s26, 4  ;;  %s509_s30 = sshll.u32 %s952_s6, 4  ;;  %s508_s27 = int_to_ptr.vmem [resolvable:$true] %s507_s27  ;;  %s510_s30 = int_to_ptr.hbm [resolvable:$true] %s509_s30 }
  0x21   :  { %247 = vmatpush.bf16.msra.mxu2 %v577_v21  ;;  %v723_v52 = vld [vmem:[#allocation7 + $0x78] sm:$0xff]  ;;  %393 = vmatpush.bf16.msra.mxu3 %v715_v51  ;;  %v722_v54 = vld [vmem:[#allocation7 + $0x70] sm:$0xff]  ;;  %v721_v56 = vld [vmem:[#allocation7 + $0x68] sm:$0xff] }
  0x22   :  { %406 = vmatpush.bf16.msrb.mxu0 %v723_v52  ;;  %v712_v57 = vld [vmem:[#allocation7 + $0x20] sm:$0xff]  ;;  %v711_v59 = vld [vmem:[#allocation7 + $0x18] sm:$0xff]  ;;  %v710_v61 = vld [vmem:[#allocation7 + $0x10] sm:$0xff] }
  0x23   :  { %v720_v58 = vld [vmem:[#allocation7 + $0x60] sm:$0xff]  ;;  %v719_v60 = vld [vmem:[#allocation7 + $0x58] sm:$0xff]  ;;  %v741_v62 = vld [vmem:[%s951_s5] ss:$0 sm:$0xff] }
  0x24   :  { %235 = vmatpush.bf16.msra.mxu1 %v565_v25  ;;  %v709_v4 = vld [vmem:[#allocation7 + $0x8] sm:$0xff]  ;;  %v718_v5 = vld [vmem:[#allocation7 + $0x50] sm:$0xff]  ;;  %v708_v6 = vld [vmem:[#allocation7] sm:$0xff] }
  0x25   :  { %248 = vmatpush.bf16.msra.mxu2 %v569_v26  ;;  %394 = vmatpush.bf16.msra.mxu3 %v714_v53  ;;  %v717_v7 = vld [vmem:[#allocation7 + $0x48] sm:$0xff]  ;;  %v716_v8 = vld [vmem:[#allocation7 + $0x40] sm:$0xff]  ;;  %v731_v9 = vld [vmem:[#allocation8 + $0x38] sm:$0xff] }
  0x26   :  { %407 = vmatpush.bf16.msrb.mxu0 %v722_v54  ;;  %v730_v10 = vld [vmem:[#allocation8 + $0x30] sm:$0xff]  ;;  %v729_v11 = vld [vmem:[#allocation8 + $0x28] sm:$0xff]  ;;  %v728_v12 = vld [vmem:[#allocation8 + $0x20] sm:$0xff] }
  0x27   :  { %v89_v13 = vld [vmem:[%s951_s5 + $0x1] sm:$0x3]  ;;  %v727_v14 = vld [vmem:[#allocation8 + $0x18] sm:$0xff]  ;;  %v725_v28 = vld [vmem:[#allocation8 + $0x8] sm:$0xff] }
  0x28   :  { %236 = vmatpush.bf16.msra.mxu1 %v557_v31  ;;  %v148_v15 = vperm.slane %v89_v13, 0  ;;  %v726_v17 = vld [vmem:[#allocation8 + $0x10] sm:$0xff]  ;;  %v149_v20 = vperm.slane %v89_v13, 1  ;;  %v724_v29 = vld [vmem:[#allocation8] sm:$0xff] }
  0x29   :  { %249 = vmatpush.bf16.msra.mxu2 %v561_v32  ;;  %395 = vmatpush.bf16.msra.mxu3 %v713_v55  ;;  %v742_v30 = vld [vmem:[%s951_s5 + $0x3] ss:$0 sm:$0xff]  ;;  %v743_v39 = vld [vmem:[%s951_s5 + $0x4] ss:$0 sm:$0xff] }
  0x2a   :  { %408 = vmatpush.bf16.msrb.mxu0 %v721_v56 }
  0x2c   :  { %237 = vmatpush.bf16.msra.mxu1 %v549_v37 }
  0x2d   :  { %250 = vmatpush.bf16.msra.mxu2 %v553_v38  ;;  %396 = vmatpush.bf16.msra.mxu3 %v712_v57 }
  0x2e   :  { %409 = vmatpush.bf16.msrb.mxu0 %v720_v58 }
  0x30   :  { %238 = vmatpush.bf16.msra.mxu1 %v541_v42 }
  0x31   :  { %251 = vmatpush.bf16.msra.mxu2 %v545_v44  ;;  %397 = vmatpush.bf16.msra.mxu3 %v711_v59 }
  0x32   :  { %410 = vmatpush.bf16.msrb.mxu0 %v719_v60 }
  0x34   :  { %239 = vmatpush.bf16.msra.mxu1 %v533_v48 }
  0x35   :  { %252 = vmatpush.bf16.msra.mxu2 %v537_v50  ;;  %398 = vmatpush.bf16.msra.mxu3 %v710_v61 }
  0x36   :  { %411 = vmatpush.bf16.msrb.mxu0 %v718_v5 }
  0x38   :  { %488 = vmatpush.bf16.msrb.mxu1 %v731_v9 }
  0x39   :  { %399 = vmatpush.bf16.msra.mxu3 %v709_v4 }
  0x3a   :  { %412 = vmatpush.bf16.msrb.mxu0 %v717_v7 }
  0x3c   :  { %489 = vmatpush.bf16.msrb.mxu1 %v730_v10 }
  0x3d   :  { %400 = vmatpush.bf16.msra.mxu3 %v708_v6 }
  0x3e   :  { %413 = vmatpush.bf16.msrb.mxu0 %v716_v8 }
  0x40   :  { %490 = vmatpush.bf16.msrb.mxu1 %v729_v11 }
  0x44   :  { %491 = vmatpush.bf16.msrb.mxu1 %v728_v12 }
  0x48   :  { %492 = vmatpush.bf16.msrb.mxu1 %v727_v14 }
  0x4c   :  { %493 = vmatpush.bf16.msrb.mxu1 %v726_v17 }
  0x50   :  { %494 = vmatpush.bf16.msrb.mxu1 %v725_v28 }
  0x54   :  { %495 = vmatpush.bf16.msrb.mxu1 %v724_v29 }
  0x99   :  { %v125_v63 = vpop.f32.mrf.mxu0 }
  0x9a   :  { %v126_v0 = vadd.f32 %v741_v62, %v125_v63 }
  0x9c   :  { %v129_v1 = vmax.f32 %v126_v0, 0.0 }
  0x9e   :  { %v130_v2 = vpack.c.bf16 %v129_v1, %v129_v1 }
  0xa0   :  { %240 = vmatmul.bf16.vlgmr.msra.gmra.mxu1 %v130_v2  ;;  %253 = vmatmul.bf16.vlgmr.msra.gmra.mxu2 %v130_v2 }
  0xa1   :  { %v127_v3 = vpop.f32.mrf.mxu0 }
 0x11d   :  { %v241_v16 = vpop.f32.mrf.mxu1 }
 0x11e   :  { %v242_v18 = vadd.f32 %v241_v16, %v148_v15 }
 0x120   :  { %v258_v19 = vmax.f32 %v242_v18, 0.0 }
 0x122   :  { %v260_v21 = vpack.c.bf16 %v258_v19, %v258_v19 }
 0x123   :  { %v254_v22 = vpop.f32.mrf.mxu2 }
 0x124   :  { %v255_v23 = vadd.f32 %v254_v22, %v149_v20  ;;  %401 = vmatmul.bf16.vlgmr.msra.gmra.mxu3 %v260_v21 }
 0x125   :  { %v243_v24 = vpop.f32.mrf.mxu1 }
 0x126   :  { %v259_v25 = vmax.f32 %v255_v23, 0.0 }
 0x128   :  { %v261_v26 = vpack.c.bf16 %v259_v25, %v259_v25 }
 0x12a   :  { %414 = vmatmul.bf16.vlgmr.msrb.gmra.mxu0 %v261_v26 }
 0x12b   :  { %v256_v27 = vpop.f32.mrf.mxu2 }
 0x1a7   :  { %v402_v31 = vpop.f32.mrf.mxu3  ;;  %v415_v32 = vpop.f32.mrf.mxu0 }
 0x1a8   :  { %v403_v33 = vadd.f32 %v742_v30, %v402_v31 }
 0x1aa   :  { %v416_v34 = vadd.f32 %v415_v32, %v403_v33 }
 0x1ac   :  { %v419_v35 = vmax.f32 %v416_v34, 0.0 }
 0x1ae   :  { %v420_v36 = vpack.c.bf16 %v419_v35, %v419_v35 }
 0x1af   :  { %v404_v37 = vpop.f32.mrf.mxu3  ;;  %v417_v38 = vpop.f32.mrf.mxu0 }
 0x1b0   :  { %496 = vmatmul.bf16.vlgmr.msrb.gmra.mxu1 %v420_v36 }
 0x22d   :  { %v497_v40 = vpop.f32.mrf.mxu1 }
 0x22e   :  { %v498_v41 = vadd.f32 %v743_v39, %v497_v40 }
 0x230   :  { %501 = vst [vmem:[#allocation10] sm:$0xff] %v498_v41 }
 0x231   :  { %512 = dma.vmem_to_hbm [thread:$0]  %s508_s27, 128, %s510_s30, [#allocation4]  }
 0x235   :  { %v499_v42 = vpop.f32.mrf.mxu1 }
 0x236   :  { %870 = dma.done.wait [#allocation4], 128  }
 0x237   :  { %871 = vsyncadd [#allocation4], 4294967168 }
 0x238   :  { %517 = vsyncpa [#allocation3], 1 }
 0x239   :  { %518 = vsyncpa [#allocation6], 1 }
 0x23a   :  { %519 = vsyncpa [#allocation9], 1 }
 0x23b   :  { %520 = vsyncpa [#allocation4], 1 }

</bundles_post_ra>
